<compile_context>
chip_gen: v7x
topology: tpu7x:2x2x1
jax: 0.10.0
libtpu: 0.0.40
codegen_flags: <defaults>
</compile_context>

<pallas_src>
import functools
import math

import jax
import jax.numpy as jnp
from jax import lax
from jax.experimental import pallas as pl
from jax.experimental.pallas import tpu as pltpu


def _srl(h, s):
    """Logical right shift of an int32 vector by a static amount s."""
    mask = jnp.int32((1 << (32 - s)) - 1)
    return (h >> s) & mask


def _i32(v):
    """Python int -> int32 constant with two's-complement wraparound."""
    v = v & 0xFFFFFFFF
    if v >= (1 << 31):
        v -= 1 << 32
    return jnp.int32(v)


def _cdiv(a, b):
    return (a + b - 1) // b


def _round_up(x, m):
    return ((x + m - 1) // m) * m


def _vmem_capacity_bytes():
    """Physical VMEM per core; conservative v7x default if the query fails."""
    try:
        return int(pltpu.get_tpu_info().vmem_capacity_bytes)
    except Exception:
        return 64 * 1024 * 1024


def _add_norm_kernel(seed_ref, x_ref, y_ref, w_ref, b_ref, o_ref, *,
                     eps, dropout_p, training, d_model, block_rows,
                     use_hw_prng):
    # x_ref, y_ref, o_ref: (block_rows, d_model) tiles in VMEM
    # w_ref, b_ref:        (1, d_model) LayerNorm affine params (resident)
    sub = y_ref[...].astype(jnp.float32)

    if training and dropout_p > 0.0:
        shape = sub.shape
        scale = jnp.float32(1.0 / (1.0 - dropout_p))
        if use_hw_prng:
            # Hardware PRNG: reseed per grid step so blocks (and megacore
            # shards) draw independent streams.
            pltpu.prng_seed(seed_ref[0], pl.program_id(0))
            bits = pltpu.prng_random_bits(shape)
            if jnp.issubdtype(bits.dtype, jnp.unsignedinteger):
                thresh = jnp.uint32(
                    min(int(round(dropout_p * 4294967296.0)), 0xFFFFFFFF))
                keep = bits >= thresh
            else:
                thresh = jnp.int32(int(round(dropout_p * 2147483648.0)))
                keep = (bits & jnp.int32(0x7FFFFFFF)) >= thresh
        else:
            # Fallback: counter-based integer hash (interpret / no-PRNG builds).
            # Seed and grid offset are folded into one scalar on the scalar unit.
            row = lax.broadcasted_iota(jnp.int32, shape, 0)
            col = lax.broadcasted_iota(jnp.int32, shape, 1)
            base = (pl.program_id(0) * _i32(block_rows * d_model)
                    + seed_ref[0] * _i32(0x9E3779B9))
            idx = row * jnp.int32(d_model) + col + base
            h = idx ^ _srl(idx, 16)
            h = h * _i32(0x7FEB352D)
            h = h ^ _srl(h, 15)
            h = h * _i32(0x846CA68B)
            h = h ^ _srl(h, 16)
            thresh = jnp.int32(int(round(dropout_p * 2147483648.0)))
            keep = (h & jnp.int32(0x7FFFFFFF)) >= thresh
        sub = jnp.where(keep, sub * scale, jnp.float32(0.0))

    z = x_ref[...].astype(jnp.float32) + sub

    mean = jnp.mean(z, axis=-1, keepdims=True)
    centered = z - mean
    var = jnp.mean(centered * centered, axis=-1, keepdims=True)
    inv = lax.rsqrt(var + eps)

    w = w_ref[...].astype(jnp.float32)
    b = b_ref[...].astype(jnp.float32)
    o_ref[...] = (centered * inv * w + b).astype(o_ref.dtype)


def add_norm(x, sublayer_output, weight, bias, *,
             dropout_p=0.1, training=False, eps=1e-5, seed=0,
             block_rows=None, hw_prng=True):
    """LayerNorm(x + Dropout(sublayer_output)) over the last axis."""
    assert x.shape == sublayer_output.shape
    assert 0.0 <= dropout_p < 1.0
    orig_shape = x.shape
    d_model = orig_shape[-1]
    rows = math.prod(orig_shape[:-1]) if len(orig_shape) > 1 else 1

    itemsize = jnp.dtype(x.dtype).itemsize
    # Sublane packing granularity: 8 rows for 4B dtypes, 16 for bf16, 32 for 1B.
    row_mult = max(8, 32 // max(itemsize, 1))

    # Generation-aware VMEM budget / limit.
    vmem_cap = _vmem_capacity_bytes()
    if vmem_cap >= (100 << 20):           # 128 MiB parts (v5e / v6e)
        budget, vmem_ceiling = 56 << 20, 96 << 20
    else:                                 # 64 MiB parts (v7x)
        budget, vmem_ceiling = 24 << 20, 48 << 20

    dropout_active = bool(training) and dropout_p > 0.0
    # Double-buffered x/y/out tiles plus live f32 intermediates (more live
    # block-sized temporaries in training mode: mask bits, scaled sub, z, ...).
    live_f32 = 6 if dropout_active else 3
    per_row = d_model * (6 * itemsize + 4 * live_f32)

    if block_rows is None:
        budget_rows = max(row_mult, budget // per_row)
        # Target ~4 MiB per input stream (HBM roofline needs >= ~1 MiB tiles,
        # and bigger tiles amortize the ~0.35 us/step pipeline overhead).
        target_rows = max(row_mult, (4 << 20) // (d_model * itemsize))
        block_rows = min(budget_rows, target_rows)
        # Keep >= ~8 grid steps for megacore sharding / DMA-compute overlap,
        # but never shrink a tile below ~1 MiB per stream just to get them.
        min_tile_rows = max(row_mult, (1 << 20) // (d_model * itemsize))
        steps_cap = _round_up(_cdiv(rows, 8), row_mult)
        block_rows = min(block_rows, max(steps_cap, min_tile_rows))
    block_rows = max(row_mult, (block_rows // row_mult) * row_mult)
    block_rows = min(block_rows, _round_up(rows, row_mult))

    num_blocks = _cdiv(rows, block_rows)

    # No host-side padding: Pallas clips the ragged last block's output DMA to
    # the array bounds, and the garbage rows of the padded input block only
    # affect rows that are never written back (the norm is strictly per-row).
    x2 = x.reshape(rows, d_model)
    y2 = sublayer_output.reshape(rows, d_model)
    w2 = weight.reshape(1, d_model)
    b2 = bias.reshape(1, d_model)
    seed_arr = jnp.asarray([seed], dtype=jnp.int32)

    # NOTE: for best store efficiency d_model should be a multiple of 128
    # (true for real transformer widths); a non-multiple still works because
    # the block spans the full last dim, just with masked partial stores.
    kernel = functools.partial(
        _add_norm_kernel, eps=float(eps), dropout_p=float(dropout_p),
        training=bool(training), d_model=int(d_model),
        block_rows=int(block_rows), use_hw_prng=bool(hw_prng))

    io_bytes = 3 * block_rows * d_model * itemsize  # per-step x/y/out tiles
    vmem_limit = int(min(vmem_ceiling,
                         max(32 << 20, 4 * io_bytes + (2 << 20))))

    out = pl.pallas_call(
        kernel,
        out_shape=jax.ShapeDtypeStruct((rows, d_model), x.dtype),
        grid_spec=pltpu.PrefetchScalarGridSpec(
            num_scalar_prefetch=1,                      # seed lives in SMEM
            grid=(num_blocks,),
            in_specs=[
                pl.BlockSpec((block_rows, d_model), lambda i, seed: (i, 0)),
                pl.BlockSpec((block_rows, d_model), lambda i, seed: (i, 0)),
                pl.BlockSpec((1, d_model), lambda i, seed: (0, 0)),
                pl.BlockSpec((1, d_model), lambda i, seed: (0, 0)),
            ],
            out_specs=pl.BlockSpec((block_rows, d_model),
                                   lambda i, seed: (i, 0)),
        ),
        compiler_params=pltpu.CompilerParams(
            dimension_semantics=("parallel",),
            vmem_limit_bytes=vmem_limit),
        cost_estimate=pl.CostEstimate(
            flops=8 * rows * d_model,
            transcendentals=rows,
            bytes_accessed=3 * rows * d_model * itemsize),
    )(seed_arr, x2, y2, w2, b2)

    return out.reshape(orig_shape)


if __name__ == "__main__":
    batch, seq, d_model = 2, 8, 128   # lane-dense d_model (multiple of 128)
    key = jax.random.PRNGKey(0)
    kx, ky = jax.random.split(key)
    x = jax.random.normal(kx, (batch, seq, d_model), dtype=jnp.float32)
    sub = jax.random.normal(ky, (batch, seq, d_model), dtype=jnp.float32)

    # PyTorch LayerNorm default init is ones/zeros; perturb slightly so the
    # affine path is actually exercised.
    weight = jnp.ones((d_model,), jnp.float32) + 0.01 * jnp.arange(
        d_model, dtype=jnp.float32)
    bias = 0.001 * jnp.arange(d_model, dtype=jnp.float32)

    # eval-mode forward (Dropout is identity, matching module.eval())
    out = add_norm(x, sub, weight, bias, dropout_p=0.1, training=False)
    jax.block_until_ready(out)

    # reference check in plain JAX
    z = x + sub
    mean = jnp.mean(z, axis=-1, keepdims=True)
    var = jnp.mean((z - mean) ** 2, axis=-1, keepdims=True)
    ref = (z - mean) / jnp.sqrt(var + 1e-5) * weight + bias
    assert jnp.allclose(out, ref, atol=1e-5, rtol=1e-5), "mismatch vs reference"

    # training-mode forward: hardware-PRNG dropout; fall back to the in-kernel
    # integer-hash path only if this build lacks the TPU PRNG lowering.
    try:
        out_train = add_norm(x, sub, weight, bias, dropout_p=0.1,
                             training=True, seed=123)
        out_train = jax.block_until_ready(out_train)
    except Exception:
        out_train = add_norm(x, sub, weight, bias, dropout_p=0.1,
                             training=True, seed=123, hw_prng=False)
        out_train = jax.block_until_ready(out_train)
    assert bool(jnp.all(jnp.isfinite(out_train))), "non-finite training output"

    print("KERNEL_OK")
</pallas_src>

<mosaic_0001>
module attributes {stable_mosaic.version = 11 : i64} {
  func.func @_add_norm_kernel(%arg0: i32, %arg1: memref<1xi32, #tpu.memory_space<smem>>, %arg2: memref<16x128xf32, #tpu.memory_space<vmem>>, %arg3: memref<16x128xf32, #tpu.memory_space<vmem>>, %arg4: memref<1x128xf32, #tpu.memory_space<vmem>>, %arg5: memref<1x128xf32, #tpu.memory_space<vmem>>, %arg6: memref<16x128xf32, #tpu.memory_space<vmem>>) attributes {dimension_semantics = [#tpu.dimension_semantics<parallel>], iteration_bounds = array<i64: 1>, scalar_prefetch = 1 : i64, scratch_operands = 0 : i64, tpu.core_type = #tpu.core_type<tc>, window_params = [{transform_indices = @transform_0, window_bounds = array<i64: 16, 128>}, {transform_indices = @transform_1, window_bounds = array<i64: 16, 128>}, {pipeline_mode = #tpu.pipeline_mode<synchronous>, transform_indices = @transform_2, window_bounds = array<i64: 1, 128>}, {pipeline_mode = #tpu.pipeline_mode<synchronous>, transform_indices = @transform_3, window_bounds = array<i64: 1, 128>}, {transform_indices = @transform_4, window_bounds = array<i64: 16, 128>}]} {
    %c0 = arith.constant 0 : index
    %c0_0 = arith.constant 0 : index
    %0 = vector.load %arg3[%c0, %c0_0] : memref<16x128xf32, #tpu.memory_space<vmem>>, vector<16x128xf32>
    %c0_1 = arith.constant 0 : index
    %c0_2 = arith.constant 0 : index
    %1 = vector.load %arg2[%c0_1, %c0_2] : memref<16x128xf32, #tpu.memory_space<vmem>>, vector<16x128xf32>
    %2 = arith.addf %1, %0 : vector<16x128xf32>
    %cst = arith.constant dense<0.000000e+00> : vector<16xf32>
    %3 = vector.multi_reduction <add>, %2, %cst [1] : vector<16x128xf32> to vector<16xf32>
    %4 = vector.shape_cast %3 : vector<16xf32> to vector<16x1xf32>
    %cst_3 = arith.constant 1.280000e+02 : f32
    %5 = vector.broadcast %cst_3 : f32 to vector<16x1xf32>
    %6 = arith.divf %4, %5 : vector<16x1xf32>
    %7 = vector.broadcast %6 : vector<16x1xf32> to vector<16x128xf32>
    %8 = arith.subf %2, %7 : vector<16x128xf32>
    %9 = arith.mulf %8, %8 : vector<16x128xf32>
    %cst_4 = arith.constant dense<0.000000e+00> : vector<16xf32>
    %10 = vector.multi_reduction <add>, %9, %cst_4 [1] : vector<16x128xf32> to vector<16xf32>
    %11 = vector.shape_cast %10 : vector<16xf32> to vector<16x1xf32>
    %cst_5 = arith.constant 1.280000e+02 : f32
    %12 = vector.broadcast %cst_5 : f32 to vector<16x1xf32>
    %13 = arith.divf %11, %12 : vector<16x1xf32>
    %cst_6 = arith.constant 9.99999974E-6 : f32
    %14 = vector.broadcast %cst_6 : f32 to vector<16x1xf32>
    %15 = arith.addf %13, %14 : vector<16x1xf32>
    %16 = math.rsqrt %15 : vector<16x1xf32>
    %c0_7 = arith.constant 0 : index
    %c0_8 = arith.constant 0 : index
    %17 = vector.load %arg4[%c0_7, %c0_8] : memref<1x128xf32, #tpu.memory_space<vmem>>, vector<1x128xf32>
    %c0_9 = arith.constant 0 : index
    %c0_10 = arith.constant 0 : index
    %18 = vector.load %arg5[%c0_9, %c0_10] : memref<1x128xf32, #tpu.memory_space<vmem>>, vector<1x128xf32>
    %19 = vector.broadcast %16 : vector<16x1xf32> to vector<16x128xf32>
    %20 = arith.mulf %8, %19 : vector<16x128xf32>
    %21 = vector.broadcast %17 : vector<1x128xf32> to vector<16x128xf32>
    %22 = arith.mulf %20, %21 : vector<16x128xf32>
    %23 = vector.broadcast %18 : vector<1x128xf32> to vector<16x128xf32>
    %24 = arith.addf %22, %23 : vector<16x128xf32>
    %c0_11 = arith.constant 0 : index
    %c0_12 = arith.constant 0 : index
    %25 = vector.load %arg6[%c0_11, %c0_12] : memref<16x128xf32, #tpu.memory_space<vmem>>, vector<16x128xf32>
    tpu.vector_store %arg6[%c0_11, %c0_12], %24 {strides = array<i32>} : memref<16x128xf32, #tpu.memory_space<vmem>>, vector<16x128xf32>,
    return
  }
  func.func @transform_0(%arg0: i32, %arg1: memref<1xi32, #tpu.memory_space<smem>>) -> (i32, i32) {
    %c0_i32 = arith.constant 0 : i32
    %c0_i32_0 = arith.constant 0 : i32
    return %arg0, %c0_i32 : i32, i32
  }
  func.func @transform_1(%arg0: i32, %arg1: memref<1xi32, #tpu.memory_space<smem>>) -> (i32, i32) {
    %c0_i32 = arith.constant 0 : i32
    %c0_i32_0 = arith.constant 0 : i32
    return %arg0, %c0_i32 : i32, i32
  }
  func.func @transform_2(%arg0: i32, %arg1: memref<1xi32, #tpu.memory_space<smem>>) -> (i32, i32) {
    %c0_i32 = arith.constant 0 : i32
    %c0_i32_0 = arith.constant 0 : i32
    %c0_i32_1 = arith.constant 0 : i32
    return %c0_i32, %c0_i32_0 : i32, i32
  }
  func.func @transform_3(%arg0: i32, %arg1: memref<1xi32, #tpu.memory_space<smem>>) -> (i32, i32) {
    %c0_i32 = arith.constant 0 : i32
    %c0_i32_0 = arith.constant 0 : i32
    %c0_i32_1 = arith.constant 0 : i32
    return %c0_i32, %c0_i32_0 : i32, i32
  }
  func.func @transform_4(%arg0: i32, %arg1: memref<1xi32, #tpu.memory_space<smem>>) -> (i32, i32) {
    %c0_i32 = arith.constant 0 : i32
    %c0_i32_0 = arith.constant 0 : i32
    return %arg0, %c0_i32 : i32, i32
  }
}

</mosaic_0001>

<bundles_post_ra>
// kernel: tpu_custom_call.1
= control target key start
LH: loop header
LB: loop body
LE: loop exit
PB: predicated region body
PF: predicated region fallthrough
CT: control target
= control target key end

     0   :  { %11 = vsyncpa [#allocation5], 0  ;;  %s284_s0 = inlined_call_operand.<no memory space> [shape: s32[1], index: 0, kind: input, shape index: {}]   ;;  %s285_s1 = inlined_call_operand.hbm [shape: f32[16,128], index: 1, kind: input, shape index: {}]   ;;  %s286_s2 = inlined_call_operand.hbm [shape: f32[16,128], index: 2, kind: input, shape index: {}]   ;;  %s287_s3 = inlined_call_operand.vmem [shape: f32[1,128], index: 3, kind: input, shape index: {}]   ;;  %s288_s4 = inlined_call_operand.vmem [shape: f32[1,128], index: 4, kind: input, shape index: {}]   ;;  %s289_s5 = inlined_call_operand.hbm [shape: f32[16,128], index: 5, kind: output, shape index: {}]  }
   0x1   :  { %12 = vsyncpa [#allocation8], 0 }
   0x2   :  { %13 = vsyncpa [#allocation6], 0  ;;  %s198_s18 = smov [#allocation4]   ;;  %s126_s21 = scalar_lea.hbm %s285_s1, 256 }
   0x3   :  { %s19_s0 = sshll.u32 %s198_s18, 4  ;;  %p127_p0 = scmp.ne.s32.totalorder %s285_s1, %s126_s21  ;;  %s20_s0 = int_to_ptr.vmem [resolvable:$true] %s19_s0 }
   0x4   :  { %p130_p1 = scmp.lt.u32.totalorder %s126_s21, %s285_s1 }
   0x6   :  { %p132_p2 = pnand %p130_p1, %p127_p0 }
   0x8   :  { %135 = shalt.err (!%p132_p2)
}
   0x9   :  { %s136_s26 = scalar_lea.vmem %s20_s0, 256  ;;  %p141_p4 = scmp.lt.s32.totalorder %s20_s0, %s20_s0 }
   0xa   :  { %p137_p3 = scmp.ne.s32.totalorder %s20_s0, %s136_s26  ;;  %p142_p5 = scmp.lt.s32.totalorder %s136_s26, %s136_s26 }
   0xc   :  { %p143_p6 = por %p142_p5, %p141_p4 }
   0xe   :  { %p144_p7 = pnand %p143_p6, %p137_p3 }
  0x10   :  { %147 = shalt.err (!%p144_p7)
}
  0x11   :  { %s199_s27 = smov 128   ;;  %s200_s28 = smov 8  }
  0x12   :  { %25 = dma.hbm_to_vmem [thread:$0]  %s285_s1, 256, %s20_s0, [#allocation5], %s199_s27, %s199_s27, %s200_s28  }
  0x13   :  { %s201_s6 = smov [#allocation7]   ;;  %s148_s10 = scalar_lea.hbm %s286_s2, 256 }
  0x14   :  { %s31_s7 = sshll.u32 %s201_s6, 4  ;;  %p149_p8 = scmp.ne.s32.totalorder %s286_s2, %s148_s10  ;;  %s32_s7 = int_to_ptr.vmem [resolvable:$true] %s31_s7 }
  0x15   :  { %p152_p9 = scmp.lt.u32.totalorder %s148_s10, %s286_s2 }
  0x17   :  { %p154_p10 = pnand %p152_p9, %p149_p8 }
  0x19   :  { %157 = shalt.err (!%p154_p10)
}
  0x1a   :  { %s158_s15 = scalar_lea.vmem %s32_s7, 256  ;;  %p163_p12 = scmp.lt.s32.totalorder %s32_s7, %s32_s7 }
  0x1b   :  { %p159_p11 = scmp.ne.s32.totalorder %s32_s7, %s158_s15  ;;  %p164_p13 = scmp.lt.s32.totalorder %s158_s15, %s158_s15 }
  0x1d   :  { %p165_p0 = por %p164_p13, %p163_p12 }
  0x1f   :  { %p166_p1 = pnand %p165_p0, %p159_p11 }
  0x21   :  { %169 = shalt.err (!%p166_p1)
}
  0x22   :  { %37 = dma.hbm_to_vmem [thread:$0]  %s286_s2, 256, %s32_s7, [#allocation8], %s199_s27, %s199_s27, %s200_s28  }
  0x23   :  { %192 = dma.done.wait [#allocation5], 256  }
  0x24   :  { %193 = vsyncadd [#allocation5], 4294967040 }
  0x25   :  { %194 = dma.done.wait [#allocation8], 256  }
  0x26   :  { %195 = vsyncadd [#allocation8], 4294967040  ;;  %v48_v0 = vld [vmem:[#allocation7] sm:$0xff]  ;;  %v50_v1 = vld [vmem:[#allocation4] sm:$0xff]  ;;  %s202_s19 = smov [#allocation9]  }
  0x27   :  { %v49_v2 = vld [vmem:[#allocation7 + $0x8] sm:$0xff]  ;;  %v52_v3 = vadd.f32 %v50_v1, %v48_v0  ;;  %v51_v4 = vld [vmem:[#allocation4 + $0x8] sm:$0xff]  ;;  %v115_v21 = vld [vmem:[%s287_s3] ss:$0 sm:$0xff]  ;;  %s102_s20 = sshll.u32 %s202_s19, 4  ;;  %s103_s20 = int_to_ptr.vmem [resolvable:$true] %s102_s20 }
  0x28   :  { %v53_v5 = vadd.f32 %v51_v4, %v49_v2  ;;  %v116_v23 = vld [vmem:[%s288_s4] ss:$0 sm:$0xff]  ;;  %s170_s21 = scalar_lea.vmem %s103_s20, 256  ;;  %p175_p3 = scmp.lt.s32.totalorder %s103_s20, %s103_s20 }
  0x29   :  { %54 = vadd.xlane.f32.xlu0 %v52_v3  ;;  %p171_p2 = scmp.ne.s32.totalorder %s103_s20, %s170_s21  ;;  %p176_p4 = scmp.lt.s32.totalorder %s170_s21, %s170_s21 }
  0x2b   :  { %p177_p5 = por %p176_p4, %p175_p3 }
  0x2d   :  { %56 = vadd.xlane.f32.xlu0 %v53_v5  ;;  %p178_p6 = pnand %p177_p5, %p171_p2 }
  0xb6   :  { %v55_v6 = vpop.xlane.xlu0 %54 }
  0xb7   :  { %v59_v7 = vmul.f32 0.0078125, %v55_v6 }
  0xb9   :  { %v61_v8 = vsub.f32 %v52_v3, %v59_v7 }
  0xba   :  { %v57_v9 = vpop.xlane.xlu0 %56 }
  0xbb   :  { %v60_v10 = vmul.f32 0.0078125, %v57_v9  ;;  %v63_v11 = vmul.f32 %v61_v8, %v61_v8 }
  0xbd   :  { %v62_v12 = vsub.f32 %v53_v5, %v60_v10  ;;  %65 = vadd.xlane.f32.xlu1 %v63_v11 }
  0xbf   :  { %v64_v13 = vmul.f32 %v62_v12, %v62_v12 }
  0xc1   :  { %67 = vadd.xlane.f32.xlu1 %v64_v13 }
 0x14a   :  { %v66_v14 = vpop.xlane.xlu1 %65 }
 0x14b   :  { %v69_v15 = vmul.f32 0.0078125, %v66_v14 }
 0x14d   :  { %v71_v16 = vadd.f32 1e-05, %v69_v15 }
 0x14e   :  { %v68_v17 = vpop.xlane.xlu1 %67 }
 0x14f   :  { %122 = vrsqrt.f32 %v71_v16  ;;  %v70_v18 = vmul.f32 0.0078125, %v68_v17 }
 0x151   :  { %v72_v19 = vadd.f32 1e-05, %v70_v18 }
 0x153   :  { %124 = vrsqrt.f32 %v72_v19 }
 0x159   :  { %v123_v20 = vpop.eup %122 }
 0x15a   :  { %v77_v22 = vmul.f32 %v123_v20, %v61_v8 }
 0x15c   :  { %v85_v24 = vmul.f32 %v115_v21, %v77_v22 }
 0x15d   :  { %v125_v25 = vpop.eup %124 }
 0x15e   :  { %v78_v26 = vmul.f32 %v125_v25, %v62_v12  ;;  %v93_v27 = vadd.f32 %v116_v23, %v85_v24 }
 0x160   :  { %v86_v28 = vmul.f32 %v115_v21, %v78_v26  ;;  %95 = vst [vmem:[#allocation9] sm:$0xff] %v93_v27 }
 0x162   :  { %v94_v29 = vadd.f32 %v116_v23, %v86_v28 }
 0x164   :  { %96 = vst [vmem:[#allocation9 + $0x8] sm:$0xff] %v94_v29 }
 0x165   :  { %181 = shalt.err (!%p178_p6)
}
 0x166   :  { %s182_s22 = scalar_lea.hbm %s289_s5, 256 }
 0x167   :  { %p183_p7 = scmp.ne.s32.totalorder %s289_s5, %s182_s22  ;;  %p186_p8 = scmp.lt.u32.totalorder %s182_s22, %s289_s5 }
 0x169   :  { %p188_p9 = pnand %p186_p8, %p183_p7 }
 0x16b   :  { %191 = shalt.err (!%p188_p9)
}
 0x16c   :  { %108 = dma.vmem_to_hbm [thread:$0]  %s103_s20, 256, %s289_s5, [#allocation6], %s199_s27, %s199_s27, %s200_s28  }
 0x16d   :  { %196 = dma.done.wait [#allocation6], 256  }
 0x16e   :  { %197 = vsyncadd [#allocation6], 4294967040 }
 0x16f   :  { %112 = vsyncpa [#allocation5], 1 }
 0x170   :  { %113 = vsyncpa [#allocation8], 1 }
 0x171   :  { %114 = vsyncpa [#allocation6], 1 }

</bundles_post_ra>
